<compile_context>
chip_gen: v7x
topology: tpu7x:2x2x1
jax: 0.10.0
libtpu: 0.0.40
codegen_flags: <defaults>
</compile_context>

<pallas_src>
import jax
import jax.numpy as jnp
from jax.experimental import pallas as pl
from jax.experimental.pallas import tpu as pltpu


def _softmax_kernel(x_ref, o_ref):
    # Numerically-stable row-wise softmax over the last (ops) axis.
    # Compute in f32 regardless of input dtype (required on v5e: no bf16
    # VPU/EUP path; also needed for the stable max-subtraction anyway).
    x = x_ref[...].astype(jnp.float32)
    m = jnp.max(x, axis=-1, keepdims=True)
    e = jnp.exp(x - m)
    s = jnp.sum(e, axis=-1, keepdims=True)
    o_ref[...] = (e / s).astype(o_ref.dtype)


def policy_forward(arch_parameters: jax.Array) -> jax.Array:
    """softmax(arch_parameters, axis=-1) as a single gridless Pallas TPU kernel.

    The whole (E, O) array is placed in VMEM as one block (block_shape equal
    to the full array extent is legal regardless of (8,128) alignment), so
    there is no grid loop, no pipelining machinery and no per-step overhead —
    just one DMA in, <1 vreg of VPU/EUP/XLU work, and one DMA out.
    """
    E, O = arch_parameters.shape
    n = E * O
    itemsize = jnp.dtype(arch_parameters.dtype).itemsize
    cost = pl.CostEstimate(
        flops=4 * n,            # max-cmp + sub + sum-add + div  (~120 for 6x5)
        transcendentals=n,      # one exp per element            (30 for 6x5)
        bytes_accessed=2 * n * itemsize,  # one read + one write (240 B for 6x5 f32)
    )
    return pl.pallas_call(
        _softmax_kernel,
        out_shape=jax.ShapeDtypeStruct((E, O), arch_parameters.dtype),
        in_specs=[pl.BlockSpec(memory_space=pltpu.MemorySpace.VMEM)],
        out_specs=pl.BlockSpec(memory_space=pltpu.MemorySpace.VMEM),
        cost_estimate=cost,
    )(arch_parameters)


def make_policy_params(max_nodes: int, num_ops: int, key) -> jax.Array:
    """Deterministic init mirroring 0.001 * torch.randn(num_edges, num_ops)."""
    num_edges = sum(range(max_nodes))  # i<-j edges for i in 1..max_nodes-1
    return 0.001 * jax.random.normal(key, (num_edges, num_ops), dtype=jnp.float32)


if __name__ == "__main__":
    # NAS-Bench-201-like setup: max_nodes=4 -> 6 edges; 5 candidate ops.
    max_nodes = 4
    search_space = ["none", "skip_connect", "nor_conv_1x1", "nor_conv_3x3", "avg_pool_3x3"]

    key = jax.random.PRNGKey(0)
    arch_parameters = make_policy_params(max_nodes, len(search_space), key)

    alphas = policy_forward(arch_parameters)
    jax.block_until_ready(alphas)

    # Sanity check against plain-JAX reference.
    ref = jax.nn.softmax(arch_parameters, axis=-1)
    assert alphas.shape == arch_parameters.shape
    assert jnp.allclose(alphas, ref, atol=1e-6), "softmax mismatch vs reference"
    assert jnp.allclose(jnp.sum(alphas, axis=-1), 1.0, atol=1e-5)

    # TODO(synk): genotype()/generate_arch() build Python CellStructure objects
    # (host-side bookkeeping, not tensor ops) and are intentionally not ported.

    print("KERNEL_OK")
</pallas_src>

<mosaic_0001>
module attributes {stable_mosaic.version = 11 : i64} {
  func.func @_softmax_kernel(%arg0: memref<6x5xf32, #tpu.memory_space<vmem>>, %arg1: memref<6x5xf32, #tpu.memory_space<vmem>>) attributes {dimension_semantics = [], scalar_prefetch = 0 : i64, scratch_operands = 0 : i64, tpu.core_type = #tpu.core_type<tc>} {
    %c0 = arith.constant 0 : index
    %c0_0 = arith.constant 0 : index
    %0 = vector.load %arg0[%c0, %c0_0] : memref<6x5xf32, #tpu.memory_space<vmem>>, vector<6x5xf32>
    %cst = arith.constant dense<0xFF800000> : vector<6xf32>
    %1 = vector.multi_reduction <maximumf>, %0, %cst [1] : vector<6x5xf32> to vector<6xf32>
    %2 = vector.shape_cast %1 : vector<6xf32> to vector<6x1xf32>
    %3 = vector.broadcast %2 : vector<6x1xf32> to vector<6x5xf32>
    %4 = arith.subf %0, %3 : vector<6x5xf32>
    %5 = math.exp %4 : vector<6x5xf32>
    %cst_1 = arith.constant dense<0.000000e+00> : vector<6xf32>
    %6 = vector.multi_reduction <add>, %5, %cst_1 [1] : vector<6x5xf32> to vector<6xf32>
    %7 = vector.shape_cast %6 : vector<6xf32> to vector<6x1xf32>
    %8 = vector.broadcast %7 : vector<6x1xf32> to vector<6x5xf32>
    %9 = arith.divf %5, %8 : vector<6x5xf32>
    %c0_2 = arith.constant 0 : index
    %c0_3 = arith.constant 0 : index
    %10 = vector.load %arg1[%c0_2, %c0_3] : memref<6x5xf32, #tpu.memory_space<vmem>>, vector<6x5xf32>
    tpu.vector_store %arg1[%c0_2, %c0_3], %9 {strides = array<i32>} : memref<6x5xf32, #tpu.memory_space<vmem>>, vector<6x5xf32>,
    return
  }
}

</mosaic_0001>

<bundles_post_ra>
// kernel: tpu_custom_call.1
= control target key start
LH: loop header
LB: loop body
LE: loop exit
PB: predicated region body
PF: predicated region fallthrough
CT: control target
= control target key end

     0   :  { %6 = vsyncpa [#allocation3], 0  ;;  %s143_s0 = inlined_call_operand.hbm [shape: f32[6,5], index: 0, kind: input, shape index: {}]   ;;  %s144_s1 = inlined_call_operand.hbm [shape: f32[6,5], index: 1, kind: output, shape index: {}]  }
   0x1   :  { %7 = vsyncpa [#allocation4], 0  ;;  %s104_s6 = smov [#allocation2]   ;;  %s56_s10 = scalar_lea.hbm %s143_s0, 128 }
   0x2   :  { %s14_s7 = sshll.u32 %s104_s6, 4  ;;  %p57_p0 = scmp.ne.s32.totalorder %s143_s0, %s56_s10  ;;  %s15_s7 = int_to_ptr.vmem [resolvable:$true] %s14_s7 }
   0x3   :  { %p60_p1 = scmp.lt.u32.totalorder %s56_s10, %s143_s0 }
   0x5   :  { %p62_p2 = pnand %p60_p1, %p57_p0 }
   0x7   :  { %65 = shalt.err (!%p62_p2)
}
   0x8   :  { %s66_s15 = scalar_lea.vmem %s15_s7, 128  ;;  %p71_p4 = scmp.lt.s32.totalorder %s15_s7, %s15_s7 }
   0x9   :  { %p67_p3 = scmp.ne.s32.totalorder %s15_s7, %s66_s15  ;;  %p72_p5 = scmp.lt.s32.totalorder %s66_s15, %s66_s15 }
   0xb   :  { %p73_p6 = por %p72_p5, %p71_p4 }
   0xd   :  { %p74_p7 = pnand %p73_p6, %p67_p3 }
   0xf   :  { %77 = shalt.err (!%p74_p7)
}
  0x10   :  { %17 = dma.hbm_to_vmem [thread:$0]  %s143_s0, 128, %s15_s7, [#allocation3]  }
  0x11   :  { %100 = dma.done.wait [#allocation3], 128  }
  0x12   :  { %101 = vsyncadd [#allocation3], 4294967168  ;;  %vm22_vm0 = vcmask 37888   ;;  %v21_v0 = vld [vmem:[#allocation2] sm:$0x3f]  ;;  %s105_s18 = smov [#allocation5]  }
  0x13   :  { %v23_v1 = vsel %vm22_vm0, %v21_v0, -inf  ;;  %s41_s19 = sshll.u32 %s105_s18, 4  ;;  %s42_s19 = int_to_ptr.vmem [resolvable:$true] %s41_s19 }
  0x14   :  { %24 = vmax.xlane.f32.xlu0 %v23_v1  ;;  %s78_s0 = scalar_lea.vmem %s42_s19, 128  ;;  %p83_p9 = scmp.lt.s32.totalorder %s42_s19, %s42_s19 }
  0x15   :  { %p79_p8 = scmp.ne.s32.totalorder %s42_s19, %s78_s0  ;;  %p84_p10 = scmp.lt.s32.totalorder %s78_s0, %s78_s0 }
  0x17   :  { %p85_p11 = por %p84_p10, %p83_p9 }
  0x19   :  { %p86_p12 = pnand %p85_p11, %p79_p8 }
  0xa1   :  { %v25_v2 = vpop.xlane.xlu0 %24 }
  0xa2   :  { %v26_v3 = vsub.f32 %v21_v0, %v25_v2 }
  0xa4   :  { %v27_v4 = vmul.f32 1.442695, %v26_v3 }
  0xa6   :  { %52 = vpow2.f32 %v27_v4 }
  0xb0   :  { %v53_v5 = vpop.eup %52 }
  0xb1   :  { %v29_v6 = vsel %vm22_vm0, %v53_v5, 0.0 }
  0xb2   :  { %30 = vadd.xlane.f32.xlu0 %v29_v6 }
 0x13f   :  { %v31_v7 = vpop.xlane.xlu0 %30 }
 0x140   :  { %54 = vrcp.f32 %v31_v7 }
 0x14a   :  { %v55_v8 = vpop.eup %54 }
 0x14b   :  { %v33_v9 = vmul.f32 %v55_v8, %v53_v5 }
 0x14d   :  { %34 = vst.msk [vmem:[#allocation5] sm:$0x3f] %vm22_vm0, %v33_v9 }
 0x14e   :  { %89 = shalt.err (!%p86_p12)
}
 0x14f   :  { %s90_s22 = scalar_lea.hbm %s144_s1, 128 }
 0x150   :  { %p91_p13 = scmp.ne.s32.totalorder %s144_s1, %s90_s22  ;;  %p94_p0 = scmp.lt.u32.totalorder %s90_s22, %s144_s1 }
 0x152   :  { %p96_p1 = pnand %p94_p0, %p91_p13 }
 0x154   :  { %99 = shalt.err (!%p96_p1)
}
 0x155   :  { %44 = dma.vmem_to_hbm [thread:$0]  %s42_s19, 128, %s144_s1, [#allocation4]  }
 0x156   :  { %102 = dma.done.wait [#allocation4], 128  }
 0x157   :  { %103 = vsyncadd [#allocation4], 4294967168 }
 0x158   :  { %48 = vsyncpa [#allocation3], 1 }
 0x159   :  { %49 = vsyncpa [#allocation4], 1 }

</bundles_post_ra>
